<compile_context>
chip_gen: v7x
topology: tpu7x:2x2x1
jax: 0.10.0
libtpu: 0.0.40
codegen_flags: <defaults>
</compile_context>

<pallas_src>
import jax
import jax.numpy as jnp
from jax.experimental import pallas as pl
from jax.experimental.pallas import tpu as pltpu


def _round_up(x: int, m: int) -> int:
    return ((x + m - 1) // m) * m


def _sublane(dtype) -> int:
    # vreg sublane packing: 8 rows for 4-byte, 16 for 2-byte, 32 for 1-byte.
    return max(8, 32 // jnp.dtype(dtype).itemsize)


def _linear_kernel(x_ref, w_ref, b_ref, o_ref, acc_ref):
    # x_ref  : (tm, tk)   activation tile
    # w_ref  : (tk, tn)   weight tile, already (in, out) layout
    # b_ref  : (1, tn)    bias tile (resident across the K axis)
    # o_ref  : (tm, tn)   output tile
    # acc_ref: (tm, tn)   f32 accumulator, persists across the K grid axis
    k = pl.program_id(2)

    @pl.when(k == 0)
    def _():
        # Seed the accumulator with the bias -> no extra add at finalize.
        acc_ref[...] = jnp.broadcast_to(
            b_ref[...].astype(jnp.float32), acc_ref.shape)

    acc_ref[...] += jnp.dot(x_ref[...], w_ref[...],
                            preferred_element_type=jnp.float32)

    @pl.when(k == pl.num_programs(2) - 1)
    def _():
        o_ref[...] = acc_ref[...].astype(o_ref.dtype)


def make_linear_layer(weight, bias, *, tm=256, tn=512, tk=1024,
                      compute_dtype=None):
    """One-time parameter prep for LinearLayer (dropout=0, norm=None, act=None).

    weight : (out_features, in_features)   (PyTorch nn.Linear convention)
    bias   : (out_features,)
    Returns forward(x) computing flatten(x, 1) @ weight.T + bias.
    """
    m_out, k_dim = weight.shape
    assert bias.shape == (m_out,)

    # N/K tiles clamped to the (padded) problem, lane-granular (128); 512/1024
    # defaults are 256-aligned for the v6e/v7x 256x256 MXU when shapes allow.
    tn = _round_up(min(tn, _round_up(m_out, 128)), 128)
    tk = _round_up(min(tk, _round_up(k_dim, 128)), 128)
    n_pad = _round_up(m_out, tn)
    k_pad = _round_up(k_dim, tk)

    # --- one-time HBM work: transpose to (in, out) and pad; never redone per call.
    w_t = jnp.asarray(weight).T
    if compute_dtype is not None:
        w_t = w_t.astype(compute_dtype)
    if w_t.shape != (k_pad, n_pad):
        w_t = jnp.pad(w_t, ((0, k_pad - k_dim), (0, n_pad - m_out)))
    b_p = jnp.asarray(bias)
    if n_pad != m_out:
        b_p = jnp.pad(b_p, (0, n_pad - m_out))
    b_p = b_p.reshape(1, n_pad)

    n_grid = n_pad // tn
    k_grid = k_pad // tk

    def forward(x):
        n = x.shape[0]
        x2d = x.reshape(n, -1)                      # torch.flatten(x, 1)
        assert x2d.shape[1] == k_dim
        out_dtype = x2d.dtype
        if compute_dtype is not None:
            x2d = x2d.astype(compute_dtype)

        sub = _sublane(x2d.dtype)
        tm_eff = _round_up(min(tm, _round_up(n, sub)), sub)
        m_pad = _round_up(n, tm_eff)
        x_p = x2d
        if x2d.shape != (m_pad, k_pad):
            # Zero padding: padded K contributes nothing; padded M sliced off.
            x_p = jnp.pad(x2d, ((0, m_pad - n), (0, k_pad - k_dim)))

        grid = (m_pad // tm_eff, n_grid, k_grid)

        if k_grid >= 3:
            # Memory-bound small-batch regime: 3-deep buffering hides DMA.
            x_spec = pl.BlockSpec((tm_eff, tk), lambda i, j, k: (i, k),
                                  pipeline_mode=pl.Buffered(3))
            w_spec = pl.BlockSpec((tk, tn), lambda i, j, k: (k, j),
                                  pipeline_mode=pl.Buffered(3))
        else:
            x_spec = pl.BlockSpec((tm_eff, tk), lambda i, j, k: (i, k))
            w_spec = pl.BlockSpec((tk, tn), lambda i, j, k: (k, j))

        out = pl.pallas_call(
            _linear_kernel,
            out_shape=jax.ShapeDtypeStruct((m_pad, n_pad), out_dtype),
            grid_spec=pltpu.PrefetchScalarGridSpec(
                num_scalar_prefetch=0,
                grid=grid,
                in_specs=[
                    x_spec,                                        # x
                    w_spec,                                        # W.T (in,out)
                    pl.BlockSpec((1, tn), lambda i, j, k: (0, j)), # bias, K-resident
                ],
                out_specs=pl.BlockSpec((tm_eff, tn), lambda i, j, k: (i, j)),
                scratch_shapes=[pltpu.VMEM((tm_eff, tn), jnp.float32)],
            ),
            compiler_params=pltpu.CompilerParams(
                dimension_semantics=("parallel", "parallel", "arbitrary"),
                vmem_limit_bytes=48 * 1024 * 1024,
            ),
        )(x_p, w_t, b_p)

        return out[:n, :m_out]

    return forward


def linear_layer_forward(x, weight, bias, **kw):
    """Convenience one-shot API (does the param prep per call)."""
    return make_linear_layer(weight, bias, **kw)(x)


# TODO(synk): dropout>0 / norm / act_func variants of LinearLayer are not
# exercised by the default constructor args; only the identity paths are
# reproduced here.


if __name__ == "__main__":
    key = jax.random.PRNGKey(0)
    k_x, k_w, k_b = jax.random.split(key, 3)

    # x: NCHW conv features feeding a head: (2, 4, 16, 16)
    N, C, H, W = 2, 4, 16, 16
    in_features = C * H * W          # 1024
    out_features = 32

    x = jax.random.normal(k_x, (N, C, H, W), dtype=jnp.float32)
    # nn.Linear-shaped synthetic params: W (out, in), b (out,)
    weight = jax.random.normal(k_w, (out_features, in_features),
                               dtype=jnp.float32) * 0.02
    bias = jax.random.normal(k_b, (out_features,), dtype=jnp.float32) * 0.02

    forward = make_linear_layer(weight, bias)   # one-time transpose/pad
    y = forward(x)
    jax.block_until_ready(y)

    # sanity check against plain JAX reference
    ref = x.reshape(N, -1) @ weight.T + bias
    assert y.shape == (N, out_features)
    assert jnp.allclose(y, ref, atol=1e-4, rtol=1e-4)

    print("KERNEL_OK")
</pallas_src>

<mosaic_0001>
module attributes {stable_mosaic.version = 11 : i64} {
  func.func @_linear_kernel(%arg0: i32, %arg1: i32, %arg2: i32, %arg3: memref<8x1024xf32, #tpu.memory_space<vmem>>, %arg4: memref<1024x128xf32, #tpu.memory_space<vmem>>, %arg5: memref<1x128xf32, #tpu.memory_space<vmem>>, %arg6: memref<8x128xf32, #tpu.memory_space<vmem>>, %arg7: memref<8x128xf32, #tpu.memory_space<vmem>>) attributes {dimension_semantics = [#tpu.dimension_semantics<parallel>, #tpu.dimension_semantics<parallel>, #tpu.dimension_semantics<arbitrary>], iteration_bounds = array<i64: 1, 1, 1>, scalar_prefetch = 0 : i64, scratch_operands = 1 : i64, tpu.core_type = #tpu.core_type<tc>, window_params = [{transform_indices = @transform_0, window_bounds = array<i64: 8, 1024>}, {transform_indices = @transform_1, window_bounds = array<i64: 1024, 128>}, {transform_indices = @transform_2, window_bounds = array<i64: 1, 128>}, {transform_indices = @transform_3, window_bounds = array<i64: 8, 128>}]} {
    %c0_i32 = arith.constant 0 : i32
    %0 = arith.cmpi eq, %arg2, %c0_i32 : i32
    %1 = arith.extui %0 : i1 to i32
    %c0_i32_0 = arith.constant 0 : i32
    %2 = arith.cmpi ne, %1, %c0_i32_0 : i32
    scf.if %2 {
      %c0_10 = arith.constant 0 : index
      %c0_11 = arith.constant 0 : index
      %12 = vector.load %arg5[%c0_10, %c0_11] : memref<1x128xf32, #tpu.memory_space<vmem>>, vector<1x128xf32>
      %13 = vector.shape_cast %12 : vector<1x128xf32> to vector<1x128xf32>
      %14 = vector.broadcast %13 : vector<1x128xf32> to vector<8x128xf32>
      %c0_12 = arith.constant 0 : index
      %c0_13 = arith.constant 0 : index
      %15 = vector.load %arg7[%c0_12, %c0_13] : memref<8x128xf32, #tpu.memory_space<vmem>>, vector<8x128xf32>
      tpu.vector_store %arg7[%c0_12, %c0_13], %14 {strides = array<i32>} : memref<8x128xf32, #tpu.memory_space<vmem>>, vector<8x128xf32>,
    } else {
    }
    %c0 = arith.constant 0 : index
    %c0_1 = arith.constant 0 : index
    %3 = vector.load %arg7[%c0, %c0_1] : memref<8x128xf32, #tpu.memory_space<vmem>>, vector<8x128xf32>
    %c0_2 = arith.constant 0 : index
    %c0_3 = arith.constant 0 : index
    %4 = vector.load %arg3[%c0_2, %c0_3] : memref<8x1024xf32, #tpu.memory_space<vmem>>, vector<8x1024xf32>
    %c0_4 = arith.constant 0 : index
    %c0_5 = arith.constant 0 : index
    %5 = vector.load %arg4[%c0_4, %c0_5] : memref<1024x128xf32, #tpu.memory_space<vmem>>, vector<1024x128xf32>
    %cst = arith.constant dense<0.000000e+00> : vector<8x128xf32>
    %6 = tpu.matmul %4, %5, %cst {dimension_numbers = #tpu.dot_dimension_numbers<[1], [0], [0], [1], [0, 0, 1, 1], [], []>} : vector<8x1024xf32>, vector<1024x128xf32>, vector<8x128xf32> -> vector<8x128xf32>
    %7 = arith.addf %3, %6 : vector<8x128xf32>
    %c0_6 = arith.constant 0 : index
    %c0_7 = arith.constant 0 : index
    %8 = vector.load %arg7[%c0_6, %c0_7] : memref<8x128xf32, #tpu.memory_space<vmem>>, vector<8x128xf32>
    tpu.vector_store %arg7[%c0_6, %c0_7], %7 {strides = array<i32>} : memref<8x128xf32, #tpu.memory_space<vmem>>, vector<8x128xf32>,
    %c0_i32_8 = arith.constant 0 : i32
    %9 = arith.cmpi eq, %arg2, %c0_i32_8 : i32
    %10 = arith.extui %9 : i1 to i32
    %c0_i32_9 = arith.constant 0 : i32
    %11 = arith.cmpi ne, %10, %c0_i32_9 : i32
    scf.if %11 {
      %c0_10 = arith.constant 0 : index
      %c0_11 = arith.constant 0 : index
      %12 = vector.load %arg7[%c0_10, %c0_11] : memref<8x128xf32, #tpu.memory_space<vmem>>, vector<8x128xf32>
      %c0_12 = arith.constant 0 : index
      %c0_13 = arith.constant 0 : index
      %13 = vector.load %arg6[%c0_12, %c0_13] : memref<8x128xf32, #tpu.memory_space<vmem>>, vector<8x128xf32>
      tpu.vector_store %arg6[%c0_12, %c0_13], %12 {strides = array<i32>} : memref<8x128xf32, #tpu.memory_space<vmem>>, vector<8x128xf32>,
    } else {
    }
    return
  }
  func.func @transform_0(%arg0: i32, %arg1: i32, %arg2: i32) -> (i32, i32) {
    %c0_i32 = arith.constant 0 : i32
    return %arg0, %arg2 : i32, i32
  }
  func.func @transform_1(%arg0: i32, %arg1: i32, %arg2: i32) -> (i32, i32) {
    %c0_i32 = arith.constant 0 : i32
    return %arg2, %arg1 : i32, i32
  }
  func.func @transform_2(%arg0: i32, %arg1: i32, %arg2: i32) -> (i32, i32) {
    %c0_i32 = arith.constant 0 : i32
    %c0_i32_0 = arith.constant 0 : i32
    return %c0_i32, %arg1 : i32, i32
  }
  func.func @transform_3(%arg0: i32, %arg1: i32, %arg2: i32) -> (i32, i32) {
    %c0_i32 = arith.constant 0 : i32
    return %arg0, %arg1 : i32, i32
  }
}

</mosaic_0001>

<bundles_post_ra>
// kernel: tpu_custom_call.1
= control target key start
LH: loop header
LB: loop body
LE: loop exit
PB: predicated region body
PF: predicated region fallthrough
CT: control target
= control target key end

     0   :  { %8 = vsyncpa [#allocation4], 0  ;;  %s910_s0 = inlined_call_operand.hbm [shape: f32[8,1024], index: 0, kind: input, shape index: {}]   ;;  %s911_s1 = inlined_call_operand.hbm [shape: f32[1024,128], index: 1, kind: input, shape index: {}]   ;;  %s912_s2 = inlined_call_operand.vmem [shape: f32[1,128], index: 2, kind: input, shape index: {}]   ;;  %s913_s3 = inlined_call_operand.hbm [shape: f32[8,128], index: 3, kind: output, shape index: {}]  }
   0x1   :  { %9 = vsyncpa [#allocation7], 0 }
   0x2   :  { %10 = vsyncpa [#allocation5], 0  ;;  %s839_s12 = smov [#allocation3]   ;;  %s840_s14 = smov [#allocation6]  }
   0x3   :  { %s17_s13 = sshll.u32 %s839_s12, 4  ;;  %s26_s15 = sshll.u32 %s840_s14, 4  ;;  %s18_s13 = int_to_ptr.vmem [resolvable:$true] %s17_s13  ;;  %s864_s15 = int_to_ptr.vmem [resolvable:$true] %s26_s15 }
   0x4   :  { %s767_s18 = scalar_lea.hbm %s910_s0, 1024 }
   0x5   :  { %p768_p0 = scmp.ne.s32.totalorder %s910_s0, %s767_s18  ;;  %p771_p1 = scmp.lt.u32.totalorder %s767_s18, %s910_s0 }
   0x7   :  { %p773_p2 = pnand %p771_p1, %p768_p0 }
   0x9   :  { %776 = shalt.err (!%p773_p2)
}
   0xa   :  { %s777_s23 = scalar_lea.vmem %s18_s13, 1024  ;;  %p782_p4 = scmp.lt.s32.totalorder %s18_s13, %s18_s13 }
   0xb   :  { %p778_p3 = scmp.ne.s32.totalorder %s18_s13, %s777_s23  ;;  %p783_p5 = scmp.lt.s32.totalorder %s777_s23, %s777_s23 }
   0xd   :  { %p784_p6 = por %p783_p5, %p782_p4 }
   0xf   :  { %p785_p7 = pnand %p784_p6, %p778_p3 }
  0x11   :  { %788 = shalt.err (!%p785_p7)
}
  0x12   :  { %20 = dma.hbm_to_vmem [thread:$0]  %s910_s0, 1024, %s18_s13, [#allocation4]  }
  0x13   :  { %s789_s28 = scalar_lea.hbm %s911_s1, 16384 }
  0x14   :  { %p790_p8 = scmp.ne.s32.totalorder %s911_s1, %s789_s28  ;;  %p793_p9 = scmp.lt.u32.totalorder %s789_s28, %s911_s1 }
  0x16   :  { %p795_p10 = pnand %p793_p9, %p790_p8 }
  0x18   :  { %798 = shalt.err (!%p795_p10)
}
  0x19   :  { %s799_s6 = scalar_lea.vmem %s864_s15, 16384  ;;  %p804_p12 = scmp.lt.s32.totalorder %s864_s15, %s864_s15 }
  0x1a   :  { %p800_p11 = scmp.ne.s32.totalorder %s864_s15, %s799_s6  ;;  %p805_p13 = scmp.lt.s32.totalorder %s799_s6, %s799_s6 }
  0x1c   :  { %p806_p0 = por %p805_p13, %p804_p12 }
  0x1e   :  { %p807_p1 = pnand %p806_p0, %p800_p11 }
  0x20   :  { %810 = shalt.err (!%p807_p1)
}
  0x21   :  { %s841_s0 = smov 128   ;;  %s842_s7 = smov 8  }
  0x22   :  { %32 = dma.hbm_to_vmem [thread:$0]  %s911_s1, 16384, %s864_s15, [#allocation7], %s841_s0, %s841_s0, %s842_s7  }
  0x23   :  { %833 = dma.done.wait [#allocation4], 1024  }
  0x24   :  { %834 = vsyncadd [#allocation4], 4294966272 }
  0x25   :  { %835 = dma.done.wait [#allocation7], 16384  }
  0x26   :  { %836 = vsyncadd [#allocation7], 4294950912  ;;  %v78_v0 = vld [vmem:[#allocation6 + $0x80] sm:$0xff]  ;;  %v79_v1 = vld [vmem:[#allocation6 + $0x88] sm:$0xff]  ;;  %s843_s11 = smov [#allocation8]  }
  0x27   :  { %v110_v2 = vld [vmem:[#allocation6 + $0x180] sm:$0xff]  ;;  %v634_v3 = vpack.c.bf16 %v79_v1, %v78_v0  ;;  %v111_v4 = vld [vmem:[#allocation6 + $0x188] sm:$0xff]  ;;  %v80_v11 = vld [vmem:[#allocation6 + $0x90] sm:$0xff]  ;;  %s483_s12 = sshll.u32 %s843_s11, 4  ;;  %s484_s12 = int_to_ptr.vmem [resolvable:$true] %s483_s12 }
  0x28   :  { %v62_v5 = vld [vmem:[#allocation6] sm:$0xff]  ;;  %v63_v6 = vld [vmem:[#allocation6 + $0x8] sm:$0xff]  ;;  %v666_v7 = vpack.c.bf16 %v111_v4, %v110_v2  ;;  %v81_v13 = vld [vmem:[#allocation6 + $0x98] sm:$0xff]  ;;  %s811_s13 = scalar_lea.vmem %s484_s12, 128  ;;  %p816_p3 = scmp.lt.s32.totalorder %s484_s12, %s484_s12 }
  0x29   :  { %v636_v8 = vpack.c.bf16 %v63_v6, %v62_v5  ;;  %v94_v9 = vld [vmem:[#allocation6 + $0x100] sm:$0xff]  ;;  %v95_v10 = vld [vmem:[#allocation6 + $0x108] sm:$0xff]  ;;  %635 = vmatprep.subr.bf16.mxu0 %v634_v3  ;;  %v112_v14 = vld [vmem:[#allocation6 + $0x190] sm:$0xff]  ;;  %v638_v16 = vpack.c.bf16 %v81_v13, %v80_v11  ;;  %p812_p2 = scmp.ne.s32.totalorder %s484_s12, %s811_s13  ;;  %p817_p4 = scmp.lt.s32.totalorder %s811_s13, %s811_s13 }
  0x2a   :  { %v668_v12 = vpack.c.bf16 %v95_v10, %v94_v9  ;;  %v113_v15 = vld [vmem:[#allocation6 + $0x198] sm:$0xff]  ;;  %667 = vmatprep.subr.bf16.mxu1 %v666_v7  ;;  %v64_v18 = vld [vmem:[#allocation6 + $0x10] sm:$0xff]  ;;  %v82_v23 = vld [vmem:[#allocation6 + $0xa0] sm:$0xff] }
  0x2b   :  { %637 = vmatpush3.bf16.msra.mxu0 %v636_v8  ;;  %v670_v17 = vpack.c.bf16 %v113_v15, %v112_v14  ;;  %v65_v19 = vld [vmem:[#allocation6 + $0x18] sm:$0xff]  ;;  %v96_v20 = vld [vmem:[#allocation6 + $0x110] sm:$0xff]  ;;  %v83_v24 = vld [vmem:[#allocation6 + $0xa8] sm:$0xff]  ;;  %p818_p5 = por %p817_p4, %p816_p3 }
  0x2c   :  { %669 = vmatpush3.bf16.msra.mxu1 %v668_v12  ;;  %v640_v21 = vpack.c.bf16 %v65_v19, %v64_v18  ;;  %v97_v22 = vld [vmem:[#allocation6 + $0x118] sm:$0xff]  ;;  %639 = vmatprep.subr.bf16.mxu0 %v638_v16  ;;  %v642_v26 = vpack.c.bf16 %v83_v24, %v82_v23  ;;  %v114_v27 = vld [vmem:[#allocation6 + $0x1a0] sm:$0xff]  ;;  %v115_v28 = vld [vmem:[#allocation6 + $0x1a8] sm:$0xff] }
  0x2d   :  { %671 = vmatprep.subr.bf16.mxu1 %v670_v17  ;;  %v672_v25 = vpack.c.bf16 %v97_v22, %v96_v20  ;;  %v66_v29 = vld [vmem:[#allocation6 + $0x20] sm:$0xff]  ;;  %v674_v30 = vpack.c.bf16 %v115_v28, %v114_v27  ;;  %v67_v31 = vld [vmem:[#allocation6 + $0x28] sm:$0xff]  ;;  %v84_v35 = vld [vmem:[#allocation6 + $0xb0] sm:$0xff]  ;;  %p819_p6 = pnand %p818_p5, %p812_p2 }
  0x2e   :  { %v98_v32 = vld [vmem:[#allocation6 + $0x120] sm:$0xff]  ;;  %v99_v33 = vld [vmem:[#allocation6 + $0x128] sm:$0xff]  ;;  %v644_v34 = vpack.c.bf16 %v67_v31, %v66_v29  ;;  %v85_v36 = vld [vmem:[#allocation6 + $0xb8] sm:$0xff] }
  0x2f   :  { %641 = vmatpush3.bf16.msra.mxu0 %v640_v21  ;;  %v116_v37 = vld [vmem:[#allocation6 + $0x1b0] sm:$0xff]  ;;  %v676_v38 = vpack.c.bf16 %v99_v33, %v98_v32  ;;  %v646_v39 = vpack.c.bf16 %v85_v36, %v84_v35  ;;  %v117_v40 = vld [vmem:[#allocation6 + $0x1b8] sm:$0xff]  ;;  %v86_v46 = vld [vmem:[#allocation6 + $0xc0] sm:$0xff] }
  0x30   :  { %673 = vmatpush3.bf16.msra.mxu1 %v672_v25  ;;  %643 = vmatprep.subr.bf16.mxu0 %v642_v26  ;;  %v68_v41 = vld [vmem:[#allocation6 + $0x30] sm:$0xff]  ;;  %v69_v42 = vld [vmem:[#allocation6 + $0x38] sm:$0xff]  ;;  %v678_v43 = vpack.c.bf16 %v117_v40, %v116_v37  ;;  %v87_v47 = vld [vmem:[#allocation6 + $0xc8] sm:$0xff] }
  0x31   :  { %675 = vmatprep.subr.bf16.mxu1 %v674_v30  ;;  %v100_v44 = vld [vmem:[#allocation6 + $0x130] sm:$0xff]  ;;  %v101_v45 = vld [vmem:[#allocation6 + $0x138] sm:$0xff]  ;;  %v118_v48 = vld [vmem:[#allocation6 + $0x1c0] sm:$0xff]  ;;  %v648_v50 = vpack.c.bf16 %v69_v42, %v68_v41  ;;  %v650_v52 = vpack.c.bf16 %v87_v47, %v86_v46 }
  0x32   :  { %v119_v49 = vld [vmem:[#allocation6 + $0x1c8] sm:$0xff]  ;;  %v680_v51 = vpack.c.bf16 %v101_v45, %v100_v44  ;;  %v70_v53 = vld [vmem:[#allocation6 + $0x40] sm:$0xff]  ;;  %v88_v58 = vld [vmem:[#allocation6 + $0xd0] sm:$0xff] }
  0x33   :  { %645 = vmatpush3.bf16.msra.mxu0 %v644_v34  ;;  %v71_v54 = vld [vmem:[#allocation6 + $0x48] sm:$0xff]  ;;  %v102_v55 = vld [vmem:[#allocation6 + $0x140] sm:$0xff]  ;;  %v682_v56 = vpack.c.bf16 %v119_v49, %v118_v48  ;;  %v89_v59 = vld [vmem:[#allocation6 + $0xd8] sm:$0xff] }
  0x34   :  { %677 = vmatpush3.bf16.msra.mxu1 %v676_v38  ;;  %647 = vmatprep.subr.bf16.mxu0 %v646_v39  ;;  %v103_v57 = vld [vmem:[#allocation6 + $0x148] sm:$0xff]  ;;  %v120_v60 = vld [vmem:[#allocation6 + $0x1d0] sm:$0xff]  ;;  %v121_v61 = vld [vmem:[#allocation6 + $0x1d8] sm:$0xff]  ;;  %v652_v62 = vpack.c.bf16 %v71_v54, %v70_v53  ;;  %v654_v0 = vpack.c.bf16 %v89_v59, %v88_v58 }
  0x35   :  { %679 = vmatprep.subr.bf16.mxu1 %v678_v43  ;;  %v684_v63 = vpack.c.bf16 %v103_v57, %v102_v55  ;;  %v72_v1 = vld [vmem:[#allocation6 + $0x50] sm:$0xff]  ;;  %v73_v2 = vld [vmem:[#allocation6 + $0x58] sm:$0xff]  ;;  %v686_v4 = vpack.c.bf16 %v121_v61, %v120_v60  ;;  %v90_v6 = vld [vmem:[#allocation6 + $0xe0] sm:$0xff] }
  0x36   :  { %v104_v3 = vld [vmem:[#allocation6 + $0x150] sm:$0xff]  ;;  %v105_v5 = vld [vmem:[#allocation6 + $0x158] sm:$0xff]  ;;  %v91_v7 = vld [vmem:[#allocation6 + $0xe8] sm:$0xff]  ;;  %v656_v10 = vpack.c.bf16 %v73_v2, %v72_v1 }
  0x37   :  { %649 = vmatpush3.bf16.msra.mxu0 %v648_v50  ;;  %v122_v8 = vld [vmem:[#allocation6 + $0x1e0] sm:$0xff]  ;;  %v123_v9 = vld [vmem:[#allocation6 + $0x1e8] sm:$0xff]  ;;  %v688_v13 = vpack.c.bf16 %v105_v5, %v104_v3  ;;  %v658_v14 = vpack.c.bf16 %v91_v7, %v90_v6  ;;  %v57_v17 = vld [vmem:[#allocation3 + $0x18] sm:$0xff] }
  0x38   :  { %681 = vmatpush3.bf16.msra.mxu1 %v680_v51  ;;  %651 = vmatprep.subr.bf16.mxu0 %v650_v52  ;;  %v74_v11 = vld [vmem:[#allocation6 + $0x60] sm:$0xff]  ;;  %v75_v12 = vld [vmem:[#allocation6 + $0x68] sm:$0xff]  ;;  %v690_v18 = vpack.c.bf16 %v123_v9, %v122_v8  ;;  %v92_v20 = vld [vmem:[#allocation6 + $0xf0] sm:$0xff] }
  0x39   :  { %683 = vmatprep.subr.bf16.mxu1 %v682_v56  ;;  %v106_v15 = vld [vmem:[#allocation6 + $0x160] sm:$0xff]  ;;  %v55_v16 = vld [vmem:[#allocation3 + $0x8] sm:$0xff]  ;;  %v93_v21 = vld [vmem:[#allocation6 + $0xf8] sm:$0xff]  ;;  %324 = vmatprep.mubr.f32.mxu1 %v57_v17  ;;  %v660_v24 = vpack.c.bf16 %v75_v12, %v74_v11 }
  0x3a   :  { %v107_v19 = vld [vmem:[#allocation6 + $0x168] sm:$0xff]  ;;  %254 = vmatprep.mubr.f32.mxu0 %v55_v16  ;;  %v124_v22 = vld [vmem:[#allocation6 + $0x1f0] sm:$0xff]  ;;  %v125_v23 = vld [vmem:[#allocation6 + $0x1f8] sm:$0xff]  ;;  %v662_v26 = vpack.c.bf16 %v93_v21, %v92_v20 }
  0x3b   :  { %653 = vmatpush3.bf16.msra.mxu0 %v652_v62  ;;  %v692_v25 = vpack.c.bf16 %v107_v19, %v106_v15  ;;  %v76_v27 = vld [vmem:[#allocation6 + $0x70] sm:$0xff]  ;;  %v77_v28 = vld [vmem:[#allocation6 + $0x78] sm:$0xff]  ;;  %v694_v30 = vpack.c.bf16 %v125_v23, %v124_v22  ;;  %v142_v32 = vld [vmem:[#allocation6 + $0x280] sm:$0xff] }
  0x3c   :  { %685 = vmatpush3.bf16.msra.mxu1 %v684_v63  ;;  %655 = vmatprep.subr.bf16.mxu0 %v654_v0  ;;  %v108_v29 = vld [vmem:[#allocation6 + $0x170] sm:$0xff]  ;;  %v109_v31 = vld [vmem:[#allocation6 + $0x178] sm:$0xff]  ;;  %v143_v33 = vld [vmem:[#allocation6 + $0x288] sm:$0xff]  ;;  %v664_v36 = vpack.c.bf16 %v77_v28, %v76_v27 }
  0x3d   :  { %687 = vmatprep.subr.bf16.mxu1 %v686_v4  ;;  %v174_v34 = vld [vmem:[#allocation6 + $0x380] sm:$0xff]  ;;  %v175_v35 = vld [vmem:[#allocation6 + $0x388] sm:$0xff]  ;;  %v696_v37 = vpack.c.bf16 %v109_v31, %v108_v29  ;;  %v698_v38 = vpack.c.bf16 %v143_v33, %v142_v32  ;;  %v144_v44 = vld [vmem:[#allocation6 + $0x290] sm:$0xff] }
  0x3e   :  { %v126_v39 = vld [vmem:[#allocation6 + $0x200] sm:$0xff]  ;;  %v127_v40 = vld [vmem:[#allocation6 + $0x208] sm:$0xff]  ;;  %v730_v42 = vpack.c.bf16 %v175_v35, %v174_v34  ;;  %v145_v45 = vld [vmem:[#allocation6 + $0x298] sm:$0xff] }
  0x3f   :  { %657 = vmatpush3.bf16.msra.mxu0 %v656_v10  ;;  %v158_v41 = vld [vmem:[#allocation6 + $0x300] sm:$0xff]  ;;  %v159_v43 = vld [vmem:[#allocation6 + $0x308] sm:$0xff]  ;;  %v176_v46 = vld [vmem:[#allocation6 + $0x390] sm:$0xff]  ;;  %v700_v50 = vpack.c.bf16 %v127_v40, %v126_v39  ;;  %v702_v52 = vpack.c.bf16 %v145_v45, %v144_v44 }
  0x40   :  { %689 = vmatpush3.bf16.msra.mxu1 %v688_v13  ;;  %659 = vmatprep.subr.bf16.mxu0 %v658_v14  ;;  %v177_v47 = vld [vmem:[#allocation6 + $0x398] sm:$0xff]  ;;  %v54_v48 = vld [vmem:[#allocation3] sm:$0xff]  ;;  %v56_v49 = vld [vmem:[#allocation3 + $0x10] sm:$0xff]  ;;  %v732_v51 = vpack.c.bf16 %v159_v43, %v158_v41 }
  0x41   :  { %691 = vmatprep.subr.bf16.mxu1 %v690_v18  ;;  %v128_v53 = vld [vmem:[#allocation6 + $0x210] sm:$0xff]  ;;  %v129_v54 = vld [vmem:[#allocation6 + $0x218] sm:$0xff]  ;;  %v734_v56 = vpack.c.bf16 %v177_v47, %v176_v46  ;;  %v146_v58 = vld [vmem:[#allocation6 + $0x2a0] sm:$0xff] }
  0x42   :  { %v160_v55 = vld [vmem:[#allocation6 + $0x310] sm:$0xff]  ;;  %v161_v57 = vld [vmem:[#allocation6 + $0x318] sm:$0xff]  ;;  %v147_v59 = vld [vmem:[#allocation6 + $0x2a8] sm:$0xff]  ;;  %v704_v62 = vpack.c.bf16 %v129_v54, %v128_v53 }
  0x43   :  { %661 = vmatpush3.bf16.msra.mxu0 %v660_v24  ;;  %v178_v60 = vld [vmem:[#allocation6 + $0x3a0] sm:$0xff]  ;;  %v179_v61 = vld [vmem:[#allocation6 + $0x3a8] sm:$0xff]  ;;  %v736_v63 = vpack.c.bf16 %v161_v57, %v160_v55  ;;  %v706_v0 = vpack.c.bf16 %v147_v59, %v146_v58  ;;  %v148_v6 = vld [vmem:[#allocation6 + $0x2b0] sm:$0xff] }
  0x44   :  { %693 = vmatpush3.bf16.msra.mxu1 %v692_v25  ;;  %663 = vmatprep.subr.bf16.mxu0 %v662_v26  ;;  %v130_v1 = vld [vmem:[#allocation6 + $0x220] sm:$0xff]  ;;  %v131_v2 = vld [vmem:[#allocation6 + $0x228] sm:$0xff]  ;;  %v738_v4 = vpack.c.bf16 %v179_v61, %v178_v60  ;;  %v149_v7 = vld [vmem:[#allocation6 + $0x2b8] sm:$0xff] }
  0x45   :  { %695 = vmatprep.subr.bf16.mxu1 %v694_v30  ;;  %v162_v3 = vld [vmem:[#allocation6 + $0x320] sm:$0xff]  ;;  %v163_v5 = vld [vmem:[#allocation6 + $0x328] sm:$0xff]  ;;  %v180_v8 = vld [vmem:[#allocation6 + $0x3b0] sm:$0xff]  ;;  %v708_v10 = vpack.c.bf16 %v131_v2, %v130_v1  ;;  %v710_v12 = vpack.c.bf16 %v149_v7, %v148_v6 }
  0x46   :  { %v181_v9 = vld [vmem:[#allocation6 + $0x3b8] sm:$0xff]  ;;  %v740_v11 = vpack.c.bf16 %v163_v5, %v162_v3  ;;  %v132_v13 = vld [vmem:[#allocation6 + $0x230] sm:$0xff]  ;;  %v150_v18 = vld [vmem:[#allocation6 + $0x2c0] sm:$0xff] }
  0x47   :  { %665 = vmatpush3.bf16.msra.mxu0 %v664_v36  ;;  %v133_v14 = vld [vmem:[#allocation6 + $0x238] sm:$0xff]  ;;  %v164_v15 = vld [vmem:[#allocation6 + $0x330] sm:$0xff]  ;;  %v742_v16 = vpack.c.bf16 %v181_v9, %v180_v8  ;;  %v151_v19 = vld [vmem:[#allocation6 + $0x2c8] sm:$0xff] }
  0x48   :  { %697 = vmatpush3.bf16.msra.mxu1 %v696_v37  ;;  %699 = vmatprep.subr.bf16.mxu0 %v698_v38  ;;  %v165_v17 = vld [vmem:[#allocation6 + $0x338] sm:$0xff]  ;;  %v182_v20 = vld [vmem:[#allocation6 + $0x3c0] sm:$0xff]  ;;  %v183_v21 = vld [vmem:[#allocation6 + $0x3c8] sm:$0xff]  ;;  %v712_v22 = vpack.c.bf16 %v133_v14, %v132_v13  ;;  %v714_v26 = vpack.c.bf16 %v151_v19, %v150_v18 }
  0x49   :  { %731 = vmatprep.subr.bf16.mxu1 %v730_v42  ;;  %v59_v23 = vld [vmem:[#allocation3 + $0x28] sm:$0xff]  ;;  %v61_v24 = vld [vmem:[#allocation3 + $0x38] sm:$0xff]  ;;  %v744_v25 = vpack.c.bf16 %v165_v17, %v164_v15  ;;  %v134_v27 = vld [vmem:[#allocation6 + $0x240] sm:$0xff]  ;;  %v746_v30 = vpack.c.bf16 %v183_v21, %v182_v20 }
  0x4a   :  { %255 = vmatmul.mubr.f32.vlgmr.msra.gmra.mrb[0].mxu0 %v54_v48  ;;  %v135_v28 = vld [vmem:[#allocation6 + $0x248] sm:$0xff]  ;;  %v166_v29 = vld [vmem:[#allocation6 + $0x340] sm:$0xff]  ;;  %v152_v32 = vld [vmem:[#allocation6 + $0x2d0] sm:$0xff] }
  0x4b   :  { %325 = vmatmul.mubr.f32.vlgmr.msra.gmra.mrb[0].mxu1 %v56_v49  ;;  %701 = vmatpush3.bf16.msra.mxu0 %v700_v50  ;;  %v167_v31 = vld [vmem:[#allocation6 + $0x348] sm:$0xff]  ;;  %v153_v33 = vld [vmem:[#allocation6 + $0x2d8] sm:$0xff]  ;;  %v184_v34 = vld [vmem:[#allocation6 + $0x3d0] sm:$0xff]  ;;  %v716_v36 = vpack.c.bf16 %v135_v28, %v134_v27 }
  0x4c   :  { %733 = vmatpush3.bf16.msra.mxu1 %v732_v51  ;;  %703 = vmatprep.subr.bf16.mxu0 %v702_v52  ;;  %v185_v35 = vld [vmem:[#allocation6 + $0x3d8] sm:$0xff]  ;;  %v748_v37 = vpack.c.bf16 %v167_v31, %v166_v29  ;;  %v718_v38 = vpack.c.bf16 %v153_v33, %v152_v32  ;;  %v136_v39 = vld [vmem:[#allocation6 + $0x250] sm:$0xff]  ;;  %v154_v44 = vld [vmem:[#allocation6 + $0x2e0] sm:$0xff] }
  0x4d   :  { %735 = vmatprep.subr.bf16.mxu1 %v734_v56  ;;  %394 = vmatprep.mubr.f32.mxu0 %v59_v23  ;;  %v137_v40 = vld [vmem:[#allocation6 + $0x258] sm:$0xff]  ;;  %v168_v41 = vld [vmem:[#allocation6 + $0x350] sm:$0xff]  ;;  %v750_v42 = vpack.c.bf16 %v185_v35, %v184_v34  ;;  %v155_v45 = vld [vmem:[#allocation6 + $0x2e8] sm:$0xff] }
  0x4e   :  { %464 = vmatprep.mubr.f32.mxu1 %v61_v24  ;;  %v169_v43 = vld [vmem:[#allocation6 + $0x358] sm:$0xff]  ;;  %v186_v46 = vld [vmem:[#allocation6 + $0x3e0] sm:$0xff]  ;;  %v187_v47 = vld [vmem:[#allocation6 + $0x3e8] sm:$0xff]  ;;  %v720_v48 = vpack.c.bf16 %v137_v40, %v136_v39  ;;  %v722_v50 = vpack.c.bf16 %v155_v45, %v154_v44 }
  0x4f   :  { %705 = vmatpush3.bf16.msra.mxu0 %v704_v62  ;;  %v752_v49 = vpack.c.bf16 %v169_v43, %v168_v41  ;;  %v138_v51 = vld [vmem:[#allocation6 + $0x260] sm:$0xff]  ;;  %v139_v52 = vld [vmem:[#allocation6 + $0x268] sm:$0xff]  ;;  %v754_v54 = vpack.c.bf16 %v187_v47, %v186_v46  ;;  %v156_v56 = vld [vmem:[#allocation6 + $0x2f0] sm:$0xff] }
  0x50   :  { %737 = vmatpush3.bf16.msra.mxu1 %v736_v63  ;;  %707 = vmatprep.subr.bf16.mxu0 %v706_v0  ;;  %v170_v53 = vld [vmem:[#allocation6 + $0x360] sm:$0xff]  ;;  %v171_v55 = vld [vmem:[#allocation6 + $0x368] sm:$0xff]  ;;  %v157_v57 = vld [vmem:[#allocation6 + $0x2f8] sm:$0xff]  ;;  %v724_v60 = vpack.c.bf16 %v139_v52, %v138_v51 }
  0x51   :  { %739 = vmatprep.subr.bf16.mxu1 %v738_v4  ;;  %v188_v58 = vld [vmem:[#allocation6 + $0x3f0] sm:$0xff]  ;;  %v189_v59 = vld [vmem:[#allocation6 + $0x3f8] sm:$0xff]  ;;  %v756_v61 = vpack.c.bf16 %v171_v55, %v170_v53  ;;  %v726_v62 = vpack.c.bf16 %v157_v57, %v156_v56  ;;  %v58_v6 = vld [vmem:[#allocation3 + $0x20] sm:$0xff] }
  0x52   :  { %v140_v63 = vld [vmem:[#allocation6 + $0x270] sm:$0xff]  ;;  %v141_v0 = vld [vmem:[#allocation6 + $0x278] sm:$0xff]  ;;  %v758_v1 = vpack.c.bf16 %v189_v59, %v188_v58 }
  0x53   :  { %709 = vmatpush3.bf16.msra.mxu0 %v708_v10  ;;  %v172_v2 = vld [vmem:[#allocation6 + $0x370] sm:$0xff]  ;;  %v173_v3 = vld [vmem:[#allocation6 + $0x378] sm:$0xff]  ;;  %v728_v4 = vpack.c.bf16 %v141_v0, %v140_v63 }
  0x54   :  { %741 = vmatpush3.bf16.msra.mxu1 %v740_v11  ;;  %711 = vmatprep.subr.bf16.mxu0 %v710_v12  ;;  %v760_v5 = vpack.c.bf16 %v173_v3, %v172_v2  ;;  %v60_v7 = vld [vmem:[#allocation3 + $0x30] sm:$0xff] }
  0x55   :  { %743 = vmatprep.subr.bf16.mxu1 %v742_v16 }
  0x57   :  { %713 = vmatpush3.bf16.msra.mxu0 %v712_v22  ;;  %v493_v22 = vld [vmem:[%s912_s2] ss:$0 sm:$0xff] }
  0x58   :  { %745 = vmatpush3.bf16.msra.mxu1 %v744_v25  ;;  %715 = vmatprep.subr.bf16.mxu0 %v714_v26 }
  0x59   :  { %747 = vmatprep.subr.bf16.mxu1 %v746_v30 }
  0x5b   :  { %717 = vmatpush3.bf16.msra.mxu0 %v716_v36 }
  0x5c   :  { %749 = vmatpush3.bf16.msra.mxu1 %v748_v37  ;;  %719 = vmatprep.subr.bf16.mxu0 %v718_v38 }
  0x5d   :  { %751 = vmatprep.subr.bf16.mxu1 %v750_v42 }
  0x5f   :  { %721 = vmatpush3.bf16.msra.mxu0 %v720_v48 }
  0x60   :  { %753 = vmatpush3.bf16.msra.mxu1 %v752_v49  ;;  %723 = vmatprep.subr.bf16.mxu0 %v722_v50 }
  0x61   :  { %755 = vmatprep.subr.bf16.mxu1 %v754_v54 }
  0x63   :  { %725 = vmatpush3.bf16.msra.mxu0 %v724_v60 }
  0x64   :  { %757 = vmatpush3.bf16.msra.mxu1 %v756_v61  ;;  %727 = vmatprep.subr.bf16.mxu0 %v726_v62 }
  0x65   :  { %759 = vmatprep.subr.bf16.mxu1 %v758_v1 }
  0x67   :  { %729 = vmatpush3.bf16.msra.mxu0 %v728_v4 }
  0x68   :  { %761 = vmatpush3.bf16.msra.mxu1 %v760_v5 }
  0x6a   :  { %395 = vmatmul.mubr.f32.vlgmr.msra.gmra.mrb[2].mxu0 %v58_v6 }
  0x6b   :  { %465 = vmatmul.mubr.f32.vlgmr.msra.gmra.mrb[2].mxu1 %v60_v7 }
 0x11d   :  { %v526_v8 = vpop.f32.mrb[0].mxu0 }
 0x11e   :  { %v561_v9 = vpop.f32.mrb[0].mxu1  ;;  %v527_v10 = vpop.f32.mrb[1].mxu0 }
 0x11f   :  { %v528_v11 = vadd.f32 %v527_v10, %v526_v8  ;;  %v562_v12 = vpop.f32.mrb[1].mxu1 }
 0x120   :  { %v563_v13 = vadd.f32 %v562_v12, %v561_v9 }
 0x122   :  { %v327_v14 = vadd.f32 %v563_v13, %v528_v11 }
 0x13d   :  { %v596_v15 = vpop.f32.mrb[2].mxu0 }
 0x13e   :  { %v597_v16 = vpop.f32.mrb[3].mxu0  ;;  %v631_v17 = vpop.f32.mrb[2].mxu1 }
 0x13f   :  { %v598_v18 = vadd.f32 %v597_v16, %v596_v15  ;;  %v632_v19 = vpop.f32.mrb[3].mxu1 }
 0x140   :  { %v633_v20 = vadd.f32 %v632_v19, %v631_v17 }
 0x141   :  { %v397_v21 = vadd.f32 %v598_v18, %v327_v14 }
 0x143   :  { %v467_v23 = vadd.f32 %v633_v20, %v397_v21 }
 0x145   :  { %v470_v24 = vadd.f32 %v493_v22, %v467_v23 }
 0x147   :  { %476 = vst [vmem:[#allocation8] sm:$0xff] %v470_v24 }
 0x148   :  { %822 = shalt.err (!%p819_p6)
}
 0x149   :  { %s823_s16 = scalar_lea.hbm %s913_s3, 128 }
 0x14a   :  { %p824_p7 = scmp.ne.s32.totalorder %s913_s3, %s823_s16  ;;  %p827_p8 = scmp.lt.u32.totalorder %s823_s16, %s913_s3 }
 0x14c   :  { %p829_p9 = pnand %p827_p8, %p824_p7 }
 0x14e   :  { %832 = shalt.err (!%p829_p9)
}
 0x14f   :  { %486 = dma.vmem_to_hbm [thread:$0]  %s484_s12, 128, %s913_s3, [#allocation5]  }
 0x150   :  { %837 = dma.done.wait [#allocation5], 128  }
 0x151   :  { %838 = vsyncadd [#allocation5], 4294967168 }
 0x152   :  { %490 = vsyncpa [#allocation4], 1 }
 0x153   :  { %491 = vsyncpa [#allocation7], 1 }
 0x154   :  { %492 = vsyncpa [#allocation5], 1 }

</bundles_post_ra>
